<compile_context>
chip_gen: v6e
topology: v6e:2x2x1
jax: 0.10.0
libtpu: 0.0.40
codegen_flags: <defaults>
</compile_context>

<pallas_src>
import jax
import jax.numpy as jnp
from jax.experimental import pallas as pl
from jax.experimental.pallas import tpu as pltpu  # noqa: F401  (TPU backend)


def _identity_noop_kernel(x_hbm_ref, o_hbm_ref):
    # forward(x) == x.  The output aliases the input buffer
    # (input_output_aliases={0: 0}), so there is nothing to move or compute.
    # Both refs live in pl.ANY (left in HBM); no DMA is issued, no VMEM used.
    del x_hbm_ref, o_hbm_ref


def convnet_forward(x: jax.Array) -> jax.Array:
    """Identity forward pass of ConvNet, run as a (no-op) Pallas TPU kernel.

    Accepts any shape/dtype; returns an array equal to x (same shape/dtype).
    """
    return pl.pallas_call(
        _identity_noop_kernel,
        out_shape=jax.ShapeDtypeStruct(x.shape, x.dtype),
        # Leave the data where it is: raw HBM refs, no auto-generated DMA.
        in_specs=[pl.BlockSpec(memory_space=pl.ANY)],
        out_specs=pl.BlockSpec(memory_space=pl.ANY),
        # Output aliases input 0: no new HBM allocation, no copy inside the
        # kernel.  (XLA adds one defensive copy only if the caller does not
        # donate x — still never worse than an explicit copy kernel.)
        input_output_aliases={0: 0},
        # Tell the XLA scheduler this op is free.
        cost_estimate=pl.CostEstimate(flops=0, transcendentals=0,
                                      bytes_accessed=0),
    )(x)


if __name__ == "__main__":
    key = jax.random.PRNGKey(0)
    # Small NCHW input consistent with a conv-style module: batch=2, C=4, 16x16.
    x = jax.random.normal(key, (2, 4, 16, 16), dtype=jnp.float32)

    y = convnet_forward(x)
    y = jax.block_until_ready(y)

    # forward(x) == x exactly.
    assert y.shape == x.shape and y.dtype == x.dtype
    assert bool(jnp.all(y == x))
    print("KERNEL_OK")
</pallas_src>

<mosaic_0001>
module attributes {stable_mosaic.version = 11 : i64} {
  func.func @_identity_noop_kernel(%arg0: memref<2x4x16x16xf32, #tpu.memory_space<any>>, %arg1: memref<2x4x16x16xf32, #tpu.memory_space<any>>) attributes {dimension_semantics = [], scalar_prefetch = 0 : i64, scratch_operands = 0 : i64, tpu.core_type = #tpu.core_type<tc>} {
    return
  }
}

</mosaic_0001>

<bundles_post_ra>
// kernel: tpu_custom_call.1
= control target key start
LH: loop header
LB: loop body
LE: loop exit
PB: predicated region body
PF: predicated region fallthrough
CT: control target
= control target key end

     0   :  { %s16_s0 = inlined_call_operand.hbm [shape: f32[2,4,16,16], index: 0, kind: input, shape index: {}, may-alias: {0,1}]   ;;  %s17_s1 = inlined_call_operand.hbm [shape: f32[2,4,16,16], index: 1, kind: output, shape index: {}, may-alias: {0,1}]  }

</bundles_post_ra>
